<compile_context>
chip_gen: v7x
topology: tpu7x:2x2x1
jax: 0.10.0
libtpu: 0.0.40
codegen_flags: <defaults>
</compile_context>

<pallas_src>
import functools

import jax
import jax.numpy as jnp
from jax.experimental import pallas as pl
from jax.experimental.pallas import tpu as pltpu

_BN_EPS = 1e-5    # torch.nn.BatchNorm1d default eps
_DIST_EPS = 1e-8  # torch code: 1.0 / (dists + 1e-8)


def _fp_kernel(n_layers, has_points1, *refs):
    """refs = (xyz1, xyz2t, [points1], points2, layer consts..., out)."""
    i = 0
    xyz1_ref = refs[i]; i += 1           # (3, TN)
    xyz2t_ref = refs[i]; i += 1          # (S, 3)
    if has_points1:
        points1_ref = refs[i]; i += 1    # (D1, TN)
    points2_ref = refs[i]; i += 1        # (D2, S)
    layer_refs = refs[i:-1]
    out_ref = refs[-1]                   # (C_last, TN)

    x1 = xyz1_ref[...].astype(jnp.float32)     # (3, TN)
    x2 = xyz2t_ref[...].astype(jnp.float32)    # (S, 3)
    S = x2.shape[0]
    TN = x1.shape[1]

    # --- pairwise squared distances (torch formula), N on the lane axis -----
    cross = jnp.dot(x2, x1, preferred_element_type=jnp.float32)   # (S, TN)
    sq2 = jnp.sum(x2 * x2, axis=1, keepdims=True)                 # (S, 1)
    sq1 = jnp.sum(x1 * x1, axis=0, keepdims=True)                 # (1, TN)
    d = sq2 + sq1 - 2.0 * cross                                   # (S, TN)

    # --- 3 nearest neighbours: build sparse weight matrix wt[s, n] ----------
    # One cross-sublane min per pass; the equality mask is the selector.
    big = jnp.float32(1e30)
    wt = jnp.zeros((S, TN), jnp.float32)
    for _ in range(3):
        m = jnp.min(d, axis=0, keepdims=True)        # (1, TN)
        sel = d == m                                  # one-hot per column
        w = 1.0 / (m + _DIST_EPS)                     # (1, TN)
        wt = jnp.where(sel, w, wt)
        d = jnp.where(sel, big, d)
    wsum = jnp.sum(wt, axis=0, keepdims=True)         # (1, TN)

    # --- interpolation: one K=S MXU matmul, then per-point normalisation ----
    interp = jnp.dot(points2_ref[...].astype(jnp.float32), wt,
                     preferred_element_type=jnp.float32)          # (D2, TN)
    interp = interp * (1.0 / wsum)

    # --- shared MLP: 1x1 conv + folded BatchNorm(eval) + ReLU per layer -----
    # First layer split over (points1 | interp): no concat copy in VMEM.
    if has_points1:
        h = jnp.dot(layer_refs[0][...],
                    points1_ref[...].astype(jnp.float32),
                    preferred_element_type=jnp.float32)
        h = h + jnp.dot(layer_refs[1][...], interp,
                        preferred_element_type=jnp.float32)
        h = jnp.maximum(h + layer_refs[2][...], 0.0)
        k = 3
    else:
        h = jnp.dot(layer_refs[0][...], interp,
                    preferred_element_type=jnp.float32)
        h = jnp.maximum(h + layer_refs[1][...], 0.0)
        k = 2
    for _ in range(1, n_layers):
        w_ref = layer_refs[k]
        t_ref = layer_refs[k + 1]
        k += 2
        h = jnp.dot(w_ref[...], h, preferred_element_type=jnp.float32)
        h = jnp.maximum(h + t_ref[...], 0.0)

    out_ref[...] = h.astype(out_ref.dtype)


def _pick_tile_n(N, S):
    """Largest multiple of 128 that divides N with a modest (S, TN) working set."""
    if N % 128 != 0:
        return N
    budget = 6 * 1024 * 1024   # ~5 live f32 (S, TN) planes; safe on v5e/v7x
    best = 128
    t = 128
    while t <= N:
        if N % t == 0 and 5 * 4 * S * t <= budget:
            best = t
        t += 128
    return best


def pointnet_feature_propagation(xyz1, xyz2, points1, points2, layer_params,
                                 tile_n=None):
    """PointNetFeaturePropagation.forward (eval-mode BatchNorm).

    xyz1:    (B, 3, N)   point positions
    xyz2:    (B, 3, S)   sampled point positions (S >= 3)
    points1: (B, D1, N)  or None
    points2: (B, D2, S)
    layer_params: list of (w(Cout,Cin), b(Cout), gamma, beta, run_mean, run_var)
    returns: (B, mlp[-1], N)
    """
    B, C, N = xyz1.shape
    S = xyz2.shape[2]
    assert C == 3
    assert S >= 3, "TODO(synk): S == 1 broadcast branch not implemented"
    n_layers = len(layer_params)
    assert n_layers >= 1

    if tile_n is None:
        tile_n = _pick_tile_n(N, S)
    assert N % tile_n == 0

    has_points1 = points1 is not None

    # tiny transpose so the kernel keeps N on the lane axis everywhere
    xyz2t = jnp.transpose(xyz2, (0, 2, 1))                        # (B, S, 3)

    inputs = [xyz1, xyz2t]
    in_specs = [
        pl.BlockSpec((None, 3, tile_n), lambda b, n: (b, 0, n)),
        pl.BlockSpec((None, S, 3), lambda b, n: (b, 0, 0)),
    ]
    if has_points1:
        D1 = points1.shape[1]
        inputs.append(points1)
        in_specs.append(pl.BlockSpec((None, D1, tile_n), lambda b, n: (b, 0, n)))
    else:
        D1 = 0
    D2 = points2.shape[1]
    inputs.append(points2)
    in_specs.append(pl.BlockSpec((None, D2, S), lambda b, n: (b, 0, 0)))

    def const_spec(shape):
        return pl.BlockSpec(shape, lambda b, n: (0, 0))

    c_out = None
    for li, (w, bconv, gamma, beta, rm, rv) in enumerate(layer_params):
        c_out = w.shape[0]
        inv_std = (gamma / jnp.sqrt(rv + _BN_EPS)).astype(jnp.float32)
        w_f = w.astype(jnp.float32) * inv_std[:, None]        # fold BN scale into W
        shift = ((beta + (bconv - rm) * inv_std)[:, None]).astype(jnp.float32)
        if li == 0 and has_points1:
            w1a, w1b = w_f[:, :D1], w_f[:, D1:]
            inputs += [w1a, w1b, shift]
            in_specs += [const_spec(w1a.shape), const_spec(w1b.shape),
                         const_spec(shift.shape)]
        else:
            inputs += [w_f, shift]
            in_specs += [const_spec(w_f.shape), const_spec(shift.shape)]

    kernel = functools.partial(_fp_kernel, n_layers, has_points1)

    return pl.pallas_call(
        kernel,
        out_shape=jax.ShapeDtypeStruct((B, c_out, N), points2.dtype),
        grid=(B, N // tile_n),
        in_specs=in_specs,
        out_specs=pl.BlockSpec((None, c_out, tile_n), lambda b, n: (b, 0, n)),
        compiler_params=pltpu.CompilerParams(
            dimension_semantics=("parallel", "parallel")),
    )(*inputs)


def _make_params(key, in_channel, mlp):
    """Synthetic Conv1d + BatchNorm1d(eval) parameters, torch shapes."""
    params = []
    last = in_channel
    for i, out_c in enumerate(mlp):
        k = jax.random.fold_in(key, i)
        k1, k2, k3, k4, k5, k6 = jax.random.split(k, 6)
        f32 = jnp.float32
        w = 0.1 * jax.random.normal(k1, (out_c, last), f32)     # Conv1d(k=1) weight
        b = 0.1 * jax.random.normal(k2, (out_c,), f32)          # Conv1d bias
        gamma = 1.0 + 0.05 * jax.random.normal(k3, (out_c,), f32)
        beta = 0.05 * jax.random.normal(k4, (out_c,), f32)
        rmean = 0.05 * jax.random.normal(k5, (out_c,), f32)
        rvar = 1.0 + 0.1 * jax.random.uniform(k6, (out_c,), f32)
        params.append((w, b, gamma, beta, rmean, rvar))
        last = out_c
    return params


def _reference(xyz1, xyz2, points1, points2, layer_params):
    """Plain-JAX replica of the torch forward (eval-mode BN), for checking."""
    hp = jax.lax.Precision.HIGHEST
    x1 = jnp.transpose(xyz1, (0, 2, 1))       # (B, N, 3)
    x2 = jnp.transpose(xyz2, (0, 2, 1))       # (B, S, 3)
    p2 = jnp.transpose(points2, (0, 2, 1))    # (B, S, D2)

    dists = (-2.0 * jnp.einsum("bnc,bsc->bns", x1, x2, precision=hp)
             + jnp.sum(x1 ** 2, -1)[:, :, None]
             + jnp.sum(x2 ** 2, -1)[:, None, :])                  # (B, N, S)
    idx = jnp.argsort(dists, axis=-1)[:, :, :3]                   # (B, N, 3)
    d3 = jnp.take_along_axis(dists, idx, axis=-1)
    recip = 1.0 / (d3 + _DIST_EPS)
    weight = recip / jnp.sum(recip, -1, keepdims=True)            # (B, N, 3)
    gathered = jax.vmap(lambda pts, ind: pts[ind])(p2, idx)       # (B, N, 3, D2)
    interp = jnp.sum(gathered * weight[..., None], axis=2)        # (B, N, D2)

    if points1 is not None:
        newp = jnp.concatenate([jnp.transpose(points1, (0, 2, 1)), interp], -1)
    else:
        newp = interp
    h = jnp.transpose(newp, (0, 2, 1))                            # (B, Cin, N)

    for (w, b, gamma, beta, rm, rv) in layer_params:
        y = jnp.einsum("oc,bcn->bon", w, h, precision=hp) + b[None, :, None]
        y = ((y - rm[None, :, None]) / jnp.sqrt(rv[None, :, None] + _BN_EPS)
             * gamma[None, :, None] + beta[None, :, None])
        h = jnp.maximum(y, 0.0)
    return h


if __name__ == "__main__":
    B, N, S = 2, 512, 128          # N on the lane axis
    D1, D2 = 16, 32                # points1 / points2 feature channels
    mlp = [64, 32]
    in_channel = D1 + D2

    key = jax.random.PRNGKey(0)
    k1, k2, k3, k4, kp = jax.random.split(key, 5)
    xyz1 = jax.random.normal(k1, (B, 3, N), jnp.float32)
    xyz2 = jax.random.normal(k2, (B, 3, S), jnp.float32)
    points1 = jax.random.normal(k3, (B, D1, N), jnp.float32)
    points2 = jax.random.normal(k4, (B, D2, S), jnp.float32)
    params = _make_params(kp, in_channel, mlp)

    # tile_n=128 exercises the tiled path: grid = (2, 4) = 8 parallel steps.
    out = pointnet_feature_propagation(xyz1, xyz2, points1, points2, params,
                                       tile_n=128)
    out = jax.block_until_ready(out)

    assert out.shape == (B, mlp[-1], N), out.shape
    assert bool(jnp.all(jnp.isfinite(out)))

    ref = _reference(xyz1, xyz2, points1, points2, params)
    max_err = float(jnp.max(jnp.abs(out - ref)))
    assert bool(jnp.allclose(out, ref, atol=2e-3, rtol=2e-3)), max_err

    print("KERNEL_OK")
</pallas_src>

<mosaic_0001>
module attributes {stable_mosaic.version = 11 : i64} {
  func.func @_fp_kernel(%arg0: i32, %arg1: i32, %arg2: memref<1x3x128xf32, #tpu.memory_space<vmem>>, %arg3: memref<1x128x3xf32, #tpu.memory_space<vmem>>, %arg4: memref<1x16x128xf32, #tpu.memory_space<vmem>>, %arg5: memref<1x32x128xf32, #tpu.memory_space<vmem>>, %arg6: memref<64x16xf32, #tpu.memory_space<vmem>>, %arg7: memref<64x32xf32, #tpu.memory_space<vmem>>, %arg8: memref<64x1xf32, #tpu.memory_space<vmem>>, %arg9: memref<32x64xf32, #tpu.memory_space<vmem>>, %arg10: memref<32x1xf32, #tpu.memory_space<vmem>>, %arg11: memref<1x32x128xf32, #tpu.memory_space<vmem>>) attributes {dimension_semantics = [#tpu.dimension_semantics<parallel>, #tpu.dimension_semantics<parallel>], iteration_bounds = array<i64: 2, 4>, scalar_prefetch = 0 : i64, scratch_operands = 0 : i64, tpu.core_type = #tpu.core_type<tc>, window_params = [{transform_indices = @transform_0, window_bounds = array<i64: 1, 3, 128>}, {transform_indices = @transform_1, window_bounds = array<i64: 1, 128, 3>}, {transform_indices = @transform_2, window_bounds = array<i64: 1, 16, 128>}, {transform_indices = @transform_3, window_bounds = array<i64: 1, 32, 128>}, {pipeline_mode = #tpu.pipeline_mode<synchronous>, transform_indices = @transform_4, window_bounds = array<i64: 64, 16>}, {pipeline_mode = #tpu.pipeline_mode<synchronous>, transform_indices = @transform_5, window_bounds = array<i64: 64, 32>}, {pipeline_mode = #tpu.pipeline_mode<synchronous>, transform_indices = @transform_6, window_bounds = array<i64: 64, 1>}, {pipeline_mode = #tpu.pipeline_mode<synchronous>, transform_indices = @transform_7, window_bounds = array<i64: 32, 64>}, {pipeline_mode = #tpu.pipeline_mode<synchronous>, transform_indices = @transform_8, window_bounds = array<i64: 32, 1>}, {transform_indices = @transform_9, window_bounds = array<i64: 1, 32, 128>}]} {
    %c0 = arith.constant 0 : index
    %c0_0 = arith.constant 0 : index
    %c0_1 = arith.constant 0 : index
    %0 = vector.load %arg2[%c0, %c0_0, %c0_1] : memref<1x3x128xf32, #tpu.memory_space<vmem>>, vector<1x3x128xf32>
    %1 = vector.shape_cast %0 : vector<1x3x128xf32> to vector<3x128xf32>
    %c0_2 = arith.constant 0 : index
    %c0_3 = arith.constant 0 : index
    %c0_4 = arith.constant 0 : index
    %2 = vector.load %arg3[%c0_2, %c0_3, %c0_4] : memref<1x128x3xf32, #tpu.memory_space<vmem>>, vector<1x128x3xf32>
    %3 = vector.shape_cast %2 : vector<1x128x3xf32> to vector<128x3xf32>
    %cst = arith.constant dense<0.000000e+00> : vector<128x128xf32>
    %4 = tpu.matmul %3, %1, %cst {dimension_numbers = #tpu.dot_dimension_numbers<[1], [0], [0], [1], [0, 0, 1, 1], [], []>} : vector<128x3xf32>, vector<3x128xf32>, vector<128x128xf32> -> vector<128x128xf32>
    %5 = arith.mulf %3, %3 : vector<128x3xf32>
    %cst_5 = arith.constant dense<0.000000e+00> : vector<128xf32>
    %6 = vector.multi_reduction <add>, %5, %cst_5 [1] : vector<128x3xf32> to vector<128xf32>
    %7 = vector.shape_cast %6 : vector<128xf32> to vector<128x1xf32>
    %8 = arith.mulf %1, %1 : vector<3x128xf32>
    %cst_6 = arith.constant dense<0.000000e+00> : vector<128xf32>
    %9 = vector.multi_reduction <add>, %8, %cst_6 [0] : vector<3x128xf32> to vector<128xf32>
    %10 = vector.shape_cast %9 : vector<128xf32> to vector<1x128xf32>
    %11 = vector.broadcast %7 : vector<128x1xf32> to vector<128x128xf32>
    %12 = vector.broadcast %10 : vector<1x128xf32> to vector<128x128xf32>
    %13 = arith.addf %11, %12 : vector<128x128xf32>
    %cst_7 = arith.constant 2.000000e+00 : f32
    %14 = vector.broadcast %cst_7 : f32 to vector<128x128xf32>
    %15 = arith.mulf %14, %4 : vector<128x128xf32>
    %16 = arith.subf %13, %15 : vector<128x128xf32>
    %cst_8 = arith.constant 0.000000e+00 : f32
    %17 = vector.broadcast %cst_8 : f32 to vector<128x128xf32>
    %cst_9 = arith.constant dense<0x7F800000> : vector<128xf32>
    %18 = vector.multi_reduction <minimumf>, %16, %cst_9 [0] : vector<128x128xf32> to vector<128xf32>
    %19 = vector.shape_cast %18 : vector<128xf32> to vector<1x128xf32>
    %20 = vector.broadcast %19 : vector<1x128xf32> to vector<128x128xf32>
    %21 = arith.cmpf oeq, %16, %20 : vector<128x128xf32>
    %cst_10 = arith.constant 9.99999993E-9 : f32
    %22 = vector.broadcast %cst_10 : f32 to vector<1x128xf32>
    %23 = arith.addf %19, %22 : vector<1x128xf32>
    %cst_11 = arith.constant 1.000000e+00 : f32
    %24 = vector.broadcast %cst_11 : f32 to vector<1x128xf32>
    %25 = arith.divf %24, %23 : vector<1x128xf32>
    %26 = vector.shape_cast %25 : vector<1x128xf32> to vector<1x128xf32>
    %27 = vector.broadcast %26 : vector<1x128xf32> to vector<128x128xf32>
    %28 = arith.select %21, %27, %17 : vector<128x128xi1>, vector<128x128xf32>
    %cst_12 = arith.constant 1.000000e+30 : f32
    %29 = vector.broadcast %cst_12 : f32 to vector<128x128xf32>
    %30 = arith.select %21, %29, %16 : vector<128x128xi1>, vector<128x128xf32>
    %cst_13 = arith.constant dense<0x7F800000> : vector<128xf32>
    %31 = vector.multi_reduction <minimumf>, %30, %cst_13 [0] : vector<128x128xf32> to vector<128xf32>
    %32 = vector.shape_cast %31 : vector<128xf32> to vector<1x128xf32>
    %33 = vector.broadcast %32 : vector<1x128xf32> to vector<128x128xf32>
    %34 = arith.cmpf oeq, %30, %33 : vector<128x128xf32>
    %cst_14 = arith.constant 9.99999993E-9 : f32
    %35 = vector.broadcast %cst_14 : f32 to vector<1x128xf32>
    %36 = arith.addf %32, %35 : vector<1x128xf32>
    %cst_15 = arith.constant 1.000000e+00 : f32
    %37 = vector.broadcast %cst_15 : f32 to vector<1x128xf32>
    %38 = arith.divf %37, %36 : vector<1x128xf32>
    %39 = vector.shape_cast %38 : vector<1x128xf32> to vector<1x128xf32>
    %40 = vector.broadcast %39 : vector<1x128xf32> to vector<128x128xf32>
    %41 = arith.select %34, %40, %28 : vector<128x128xi1>, vector<128x128xf32>
    %cst_16 = arith.constant 1.000000e+30 : f32
    %42 = vector.broadcast %cst_16 : f32 to vector<128x128xf32>
    %43 = arith.select %34, %42, %30 : vector<128x128xi1>, vector<128x128xf32>
    %cst_17 = arith.constant dense<0x7F800000> : vector<128xf32>
    %44 = vector.multi_reduction <minimumf>, %43, %cst_17 [0] : vector<128x128xf32> to vector<128xf32>
    %45 = vector.shape_cast %44 : vector<128xf32> to vector<1x128xf32>
    %46 = vector.broadcast %45 : vector<1x128xf32> to vector<128x128xf32>
    %47 = arith.cmpf oeq, %43, %46 : vector<128x128xf32>
    %cst_18 = arith.constant 9.99999993E-9 : f32
    %48 = vector.broadcast %cst_18 : f32 to vector<1x128xf32>
    %49 = arith.addf %45, %48 : vector<1x128xf32>
    %cst_19 = arith.constant 1.000000e+00 : f32
    %50 = vector.broadcast %cst_19 : f32 to vector<1x128xf32>
    %51 = arith.divf %50, %49 : vector<1x128xf32>
    %52 = vector.shape_cast %51 : vector<1x128xf32> to vector<1x128xf32>
    %53 = vector.broadcast %52 : vector<1x128xf32> to vector<128x128xf32>
    %54 = arith.select %47, %53, %41 : vector<128x128xi1>, vector<128x128xf32>
    %cst_20 = arith.constant dense<0.000000e+00> : vector<128xf32>
    %55 = vector.multi_reduction <add>, %54, %cst_20 [0] : vector<128x128xf32> to vector<128xf32>
    %56 = vector.shape_cast %55 : vector<128xf32> to vector<1x128xf32>
    %c0_21 = arith.constant 0 : index
    %c0_22 = arith.constant 0 : index
    %c0_23 = arith.constant 0 : index
    %57 = vector.load %arg5[%c0_21, %c0_22, %c0_23] : memref<1x32x128xf32, #tpu.memory_space<vmem>>, vector<1x32x128xf32>
    %58 = vector.shape_cast %57 : vector<1x32x128xf32> to vector<32x128xf32>
    %cst_24 = arith.constant dense<0.000000e+00> : vector<32x128xf32>
    %59 = tpu.matmul %58, %54, %cst_24 {dimension_numbers = #tpu.dot_dimension_numbers<[1], [0], [0], [1], [0, 0, 1, 1], [], []>} : vector<32x128xf32>, vector<128x128xf32>, vector<32x128xf32> -> vector<32x128xf32>
    %cst_25 = arith.constant 1.000000e+00 : f32
    %60 = vector.broadcast %cst_25 : f32 to vector<1x128xf32>
    %61 = arith.divf %60, %56 : vector<1x128xf32>
    %62 = vector.broadcast %61 : vector<1x128xf32> to vector<32x128xf32>
    %63 = arith.mulf %59, %62 : vector<32x128xf32>
    %c0_26 = arith.constant 0 : index
    %c0_27 = arith.constant 0 : index
    %64 = vector.load %arg6[%c0_26, %c0_27] : memref<64x16xf32, #tpu.memory_space<vmem>>, vector<64x16xf32>
    %c0_28 = arith.constant 0 : index
    %c0_29 = arith.constant 0 : index
    %c0_30 = arith.constant 0 : index
    %65 = vector.load %arg4[%c0_28, %c0_29, %c0_30] : memref<1x16x128xf32, #tpu.memory_space<vmem>>, vector<1x16x128xf32>
    %66 = vector.shape_cast %65 : vector<1x16x128xf32> to vector<16x128xf32>
    %cst_31 = arith.constant dense<0.000000e+00> : vector<64x128xf32>
    %67 = tpu.matmul %64, %66, %cst_31 {dimension_numbers = #tpu.dot_dimension_numbers<[1], [0], [0], [1], [0, 0, 1, 1], [], []>} : vector<64x16xf32>, vector<16x128xf32>, vector<64x128xf32> -> vector<64x128xf32>
    %c0_32 = arith.constant 0 : index
    %c0_33 = arith.constant 0 : index
    %68 = vector.load %arg7[%c0_32, %c0_33] : memref<64x32xf32, #tpu.memory_space<vmem>>, vector<64x32xf32>
    %cst_34 = arith.constant dense<0.000000e+00> : vector<64x128xf32>
    %69 = tpu.matmul %68, %63, %cst_34 {dimension_numbers = #tpu.dot_dimension_numbers<[1], [0], [0], [1], [0, 0, 1, 1], [], []>} : vector<64x32xf32>, vector<32x128xf32>, vector<64x128xf32> -> vector<64x128xf32>
    %70 = arith.addf %67, %69 : vector<64x128xf32>
    %c0_35 = arith.constant 0 : index
    %c0_36 = arith.constant 0 : index
    %71 = vector.load %arg8[%c0_35, %c0_36] : memref<64x1xf32, #tpu.memory_space<vmem>>, vector<64x1xf32>
    %72 = vector.broadcast %71 : vector<64x1xf32> to vector<64x128xf32>
    %73 = arith.addf %70, %72 : vector<64x128xf32>
    %cst_37 = arith.constant 0.000000e+00 : f32
    %74 = vector.broadcast %cst_37 : f32 to vector<64x128xf32>
    %75 = arith.maximumf %73, %74 : vector<64x128xf32>
    %c0_38 = arith.constant 0 : index
    %c0_39 = arith.constant 0 : index
    %76 = vector.load %arg9[%c0_38, %c0_39] : memref<32x64xf32, #tpu.memory_space<vmem>>, vector<32x64xf32>
    %cst_40 = arith.constant dense<0.000000e+00> : vector<32x128xf32>
    %77 = tpu.matmul %76, %75, %cst_40 {dimension_numbers = #tpu.dot_dimension_numbers<[1], [0], [0], [1], [0, 0, 1, 1], [], []>} : vector<32x64xf32>, vector<64x128xf32>, vector<32x128xf32> -> vector<32x128xf32>
    %c0_41 = arith.constant 0 : index
    %c0_42 = arith.constant 0 : index
    %78 = vector.load %arg10[%c0_41, %c0_42] : memref<32x1xf32, #tpu.memory_space<vmem>>, vector<32x1xf32>
    %79 = vector.broadcast %78 : vector<32x1xf32> to vector<32x128xf32>
    %80 = arith.addf %77, %79 : vector<32x128xf32>
    %cst_43 = arith.constant 0.000000e+00 : f32
    %81 = vector.broadcast %cst_43 : f32 to vector<32x128xf32>
    %82 = arith.maximumf %80, %81 : vector<32x128xf32>
    %c0_44 = arith.constant 0 : index
    %c0_45 = arith.constant 0 : index
    %c0_46 = arith.constant 0 : index
    %83 = vector.load %arg11[%c0_44, %c0_45, %c0_46] : memref<1x32x128xf32, #tpu.memory_space<vmem>>, vector<1x32x128xf32>
    %84 = vector.shape_cast %83 : vector<1x32x128xf32> to vector<32x128xf32>
    %85 = vector.shape_cast %82 : vector<32x128xf32> to vector<1x32x128xf32>
    tpu.vector_store %arg11[%c0_44, %c0_45, %c0_46], %85 {strides = array<i32>} : memref<1x32x128xf32, #tpu.memory_space<vmem>>, vector<1x32x128xf32>,
    return
  }
  func.func @transform_0(%arg0: i32, %arg1: i32) -> (i32, i32, i32) {
    %c0_i32 = arith.constant 0 : i32
    %c0_i32_0 = arith.constant 0 : i32
    return %arg0, %c0_i32, %arg1 : i32, i32, i32
  }
  func.func @transform_1(%arg0: i32, %arg1: i32) -> (i32, i32, i32) {
    %c0_i32 = arith.constant 0 : i32
    %c0_i32_0 = arith.constant 0 : i32
    %c0_i32_1 = arith.constant 0 : i32
    return %arg0, %c0_i32, %c0_i32_0 : i32, i32, i32
  }
  func.func @transform_2(%arg0: i32, %arg1: i32) -> (i32, i32, i32) {
    %c0_i32 = arith.constant 0 : i32
    %c0_i32_0 = arith.constant 0 : i32
    return %arg0, %c0_i32, %arg1 : i32, i32, i32
  }
  func.func @transform_3(%arg0: i32, %arg1: i32) -> (i32, i32, i32) {
    %c0_i32 = arith.constant 0 : i32
    %c0_i32_0 = arith.constant 0 : i32
    %c0_i32_1 = arith.constant 0 : i32
    return %arg0, %c0_i32, %c0_i32_0 : i32, i32, i32
  }
  func.func @transform_4(%arg0: i32, %arg1: i32) -> (i32, i32) {
    %c0_i32 = arith.constant 0 : i32
    %c0_i32_0 = arith.constant 0 : i32
    %c0_i32_1 = arith.constant 0 : i32
    return %c0_i32, %c0_i32_0 : i32, i32
  }
  func.func @transform_5(%arg0: i32, %arg1: i32) -> (i32, i32) {
    %c0_i32 = arith.constant 0 : i32
    %c0_i32_0 = arith.constant 0 : i32
    %c0_i32_1 = arith.constant 0 : i32
    return %c0_i32, %c0_i32_0 : i32, i32
  }
  func.func @transform_6(%arg0: i32, %arg1: i32) -> (i32, i32) {
    %c0_i32 = arith.constant 0 : i32
    %c0_i32_0 = arith.constant 0 : i32
    %c0_i32_1 = arith.constant 0 : i32
    return %c0_i32, %c0_i32_0 : i32, i32
  }
  func.func @transform_7(%arg0: i32, %arg1: i32) -> (i32, i32) {
    %c0_i32 = arith.constant 0 : i32
    %c0_i32_0 = arith.constant 0 : i32
    %c0_i32_1 = arith.constant 0 : i32
    return %c0_i32, %c0_i32_0 : i32, i32
  }
  func.func @transform_8(%arg0: i32, %arg1: i32) -> (i32, i32) {
    %c0_i32 = arith.constant 0 : i32
    %c0_i32_0 = arith.constant 0 : i32
    %c0_i32_1 = arith.constant 0 : i32
    return %c0_i32, %c0_i32_0 : i32, i32
  }
  func.func @transform_9(%arg0: i32, %arg1: i32) -> (i32, i32, i32) {
    %c0_i32 = arith.constant 0 : i32
    %c0_i32_0 = arith.constant 0 : i32
    return %arg0, %c0_i32, %arg1 : i32, i32, i32
  }
}

</mosaic_0001>

<bundles_post_ra>
// kernel: tpu_custom_call.1
= control target key start
LH: loop header
LB: loop body
LE: loop exit
PB: predicated region body
PF: predicated region fallthrough
CT: control target
= control target key end

     0   :  { %s3182_s0 = inlined_call_operand.vmem [shape: f32[2,3,512], index: 0, kind: input, shape index: {}]   ;;  %s3183_s1 = inlined_call_operand.vmem [shape: f32[2,128,3], index: 1, kind: input, shape index: {}]   ;;  %s3184_s2 = inlined_call_operand.vmem [shape: f32[2,16,512], index: 2, kind: input, shape index: {}]   ;;  %s3185_s3 = inlined_call_operand.vmem [shape: f32[2,32,128], index: 3, kind: input, shape index: {}]   ;;  %s3186_s4 = inlined_call_operand.vmem [shape: f32[64,16], index: 4, kind: input, shape index: {}]   ;;  %s3187_s5 = inlined_call_operand.vmem [shape: f32[64,32], index: 5, kind: input, shape index: {}]   ;;  %s3188_s6 = inlined_call_operand.vmem [shape: f32[64,1], index: 6, kind: input, shape index: {}]   ;;  %s3189_s7 = inlined_call_operand.vmem [shape: f32[32,64], index: 7, kind: input, shape index: {}]   ;;  %s3190_s8 = inlined_call_operand.vmem [shape: f32[32,1], index: 8, kind: input, shape index: {}]   ;;  %s3191_s9 = inlined_call_operand.hbm [shape: f32[2,32,512], index: 9, kind: output, shape index: {}]  }
   0x1   :  { %3195 = sst [smem:[#allocation9_spill]] %s3184_s2 }
   0x2   :  { %14 = vsyncpa [#allocation4], 0 }
   0x3   :  { %16 = vsyncpa [#allocation4 + $0x1], 0  ;;  %s2282_s30 = smov 0   ;;  %s2284_s10 = smov 0  }
   0x4   :  { %s2286_s11 = smov 0   ;;  %s2288_s12 = smov 0  }
   0x5   :  { %s2290_s13 = smov 0   ;;  %s2292_s14 = smov 0  }
   0x6   :  { %s2294_s15 = smov 0   ;;  %s2296_s16 = smov 0  }
   0x7 LB: > { %s1725_s17 = sadd.s32 4294967295, %s2225_s16   ;;  %s1726_s18 = sadd.s32 4294967294, %s2225_s16   ;;  %s2225_s16 = sphi %s2296_s16, %s22_s16   ;;  %s2221_s15 = sphi %s2294_s15, %s3212_s15   ;;  %s2217_s14 = sphi %s2292_s14, %s3211_s14   ;;  %s2213_s13 = sphi %s2290_s13, %s3210_s13   ;;  %s2209_s12 = sphi %s2288_s12, %s3209_s12   ;;  %s2205_s11 = sphi %s2286_s11, %s3208_s11   ;;  %s2201_s10 = sphi %s2284_s10, %s3207_s10   ;;  %s2197_s30 = sphi %s2282_s30, %s3206_s30  }
   0x8   : > { %s31_s19 = sadd.s32 1, %s2217_s14  ;;  %s34_s20 = sadd.s32 1, %s2221_s15 }
   0x9   : > { %p32_p0 = scmp.ge.s32.totalorder %s31_s19, 4  ;;  %p104_p1 = scmp.ne.s32.totalorder %s2205_s11, %s2201_s10 }
   0xa   : > { %p105_p2 = scmp.eq.s32.totalorder %s2225_s16, 0  ;;  %p267_p5 = scmp.eq.s32.totalorder %s1725_s17, 7 }
   0xb   : > { %s3214_s19 = smov (%p32_p0, %s31_s19), 0  ;;  %s3216_s20 = smov (!%p32_p0, %s34_s20), %s2221_s15 }
   0xc   : > { %3196 = sst [smem:[#allocation6_spill]] %s3214_s19  ;;  %s93_s21 = ssub.s32 %s2217_s14, %s3214_s19 }
   0xd   : > { %p2334_p3 = por %p105_p2, %p104_p1  ;;  %p36_p4 = scmp.ge.s32.totalorder %s3216_s20, 2 }
   0xe   : > { %p272_p6 = scmp.ne.s32.totalorder %s2201_s10, %s2197_s30  ;;  %p273_p7 = scmp.eq.s32.totalorder %s1726_s18, 7 }
   0xf   : > { %s3218_s20 = smov (%p36_p4, %s3216_s20), 0  ;;  %p2342_p8 = por %p267_p5, %p104_p1 }
  0x10   : > { %3198 = sst [smem:[#allocation7_spill]] %s3218_s20  ;;  %p2346_p9 = por %p273_p7, %p272_p6 }
  0x11   : > { %s92_s25 = ssub.s32 %s2221_s15, %s3218_s20  ;;  %s97_s27 = sadd.s32 1, %s2205_s11 }
  0x12   : > { %s3200_s24 = scalar_select %p2346_p9, 1, 0 }
  0x13   : > { %s94_s26 = sor.u32 %s93_s21, %s92_s25  ;;  %p1728_p11 = scmp.ge.s32.totalorder %s2225_s16, 8 }
  0x14   : > { %3201 = sst [smem:[#allocation8_spill]] %s3200_s24  ;;  %p95_p10 = scmp.eq.s32.totalorder %s94_s26, 0 }
  0x15   : > { %304 = sbr.rel (%p1728_p11) target bundleno = 40 (0x28), region = 36 }
  0x16   : > { %s2354_s28 = scalar_select %p95_p10, %s2205_s11, %s97_s27  }
  0x1c   : > { %326 = sbr.rel (!%p2334_p3) target bundleno = 40 (0x28), region = 48  ;;  %s328_s29 = sand.u32 (%p2334_p3), 1, %s2205_s11  }
  0x1d   : > { %s1730_s17 = sshll.u32 (%p2334_p3), %s2221_s15, 3  ;;  %s1729_s18 = sshll.u32 (%p2334_p3), %s328_s29, 4 }
  0x1e   : > { %s332_s19 = sadd.s32 (%p2334_p3), %s2217_s14, %s1730_s17  ;;  %s3202_s2 = sld [smem:[#allocation9_spill]] (%p2334_p3) }
  0x1f   : > { %s1731_s24 = sshll.u32 (%p2334_p3), %s332_s19, 3  ;;  %s330_s26 = scalar_lea.vmem (%p2334_p3), [#allocation2], %s1729_s18 }
  0x24   : > { %s334_s25 = scalar_lea.vmem %s3202_s2, %s1731_s24 }
  0x25   : > { %v364_v0 = vld [vmem:[%s334_s25] sm:$0xff] }
  0x26   : > { %v366_v1 = vld [vmem:[%s334_s25 + $0x20] sm:$0xff]  ;;  %365 = vst [vmem:[%s330_s26] sm:$0xff] %v364_v0 }
  0x27   : > { %367 = vst [vmem:[%s330_s26 + $0x8] sm:$0xff] %v366_v1 }
  0x28 PF: > { %p1732_p12 = scmp.ge.s32.totalorder %s2225_s16, 1  ;;  %p380_p13 = scmp.lt.s32.totalorder %s2225_s16, 9 }
  0x2a   : > { %p381_p0 = pnand %p1732_p12, %p380_p13 }
  0x2b   : > { %p440_p1 = scmp.lt.s32.totalorder (!%p381_p0), %s2213_s13, 1  ;;  %p442_p2 = scmp.lt.s32.totalorder (!%p381_p0), %s2209_s12, 3  ;;  %vm475_vm0 = vcmask (!%p381_p0), 23552   ;;  %vm524_vm1 = vcmask (!%p381_p0), 1042432  }
  0x2c   : > { %384 = sbr.rel (%p381_p0) target bundleno = 1147 (0x47b), region = 90  ;;  %s3041_s29 = sand.u32 (!%p381_p0), 1, %s2201_s10  }
  0x2d   : > { %s1733_s17 = sshll.u32 (!%p381_p0), %s3041_s29, 4  ;;  %s1586_s25 = scalar_lea.sflag (!%p381_p0), [#allocation4], %s3041_s29 }
  0x33   : > { %s2370_s19 = scalar_select %p440_p1, %s2213_s13, 1 }
  0x34   : > { %s443_s20 = scalar_select %p442_p2, %s2209_s12, 3 }
  0x35   : > { %s1735_s22 = sshll.u32 %s2370_s19, 2  ;;  %s1783_s24 = sshll.u32 %s2370_s19, 7 }
  0x36   : > { %s445_s27 = sadd.s32 %s1735_s22, %s443_s20  ;;  %s2378_s18 = scalar_lea.vmem %s3183_s1, %s1783_s24 }
  0x37   : > { %s1736_s21 = sshll.u32 %s445_s27, 2  ;;  %v459_v2 = vld [vmem:[%s2378_s18] sm:$0xff]  ;;  %v460_v3 = vld [vmem:[%s2378_s18 + $0x8] sm:$0xff]  ;;  %v461_v4 = vld [vmem:[%s2378_s18 + $0x10] sm:$0xff]  ;;  %s1734_s22 = sshll.u32 %s3041_s29, 5 }
  0x38   : > { %s447_s2 = scalar_lea.vmem %s3182_s0, %s1736_s21  ;;  %1858 = vmatprep.mubr.msk.f32.mxu1 %vm475_vm0, %v459_v2  ;;  %v673_v5 = vmul.f32 %v459_v2, %v459_v2  ;;  %v462_v6 = vld [vmem:[%s2378_s18 + $0x18] sm:$0xff]  ;;  %v675_v7 = vmul.f32 %v461_v4, %v461_v4  ;;  %v674_v8 = vmul.f32 %v460_v3, %v460_v3  ;;  %v463_v14 = vld [vmem:[%s2378_s18 + $0x20] sm:$0xff]  ;;  %v464_v16 = vld [vmem:[%s2378_s18 + $0x28] sm:$0xff]  ;;  %s439_s27 = scalar_lea.vmem [#allocation3], %s1734_s22 }
  0x39   : > { %v458_v9 = vld [vmem:[%s447_s2] sm:$0x7]  ;;  %v676_v10 = vmul.f32 %v462_v6, %v462_v6  ;;  %v677_v18 = vmul.f32 %v463_v14, %v463_v14  ;;  %v678_v20 = vmul.f32 %v464_v16, %v464_v16  ;;  %v465_v21 = vld [vmem:[%s2378_s18 + $0x30] sm:$0xff]  ;;  %v466_v22 = vld [vmem:[%s2378_s18 + $0x38] sm:$0xff]  ;;  %s1784_s2 = sshll.u32 %s2370_s19, 5 }
  0x3a   : > { %1856 = vmatprep.subr.msk.mxu1 %vm524_vm1, %v458_v9  ;;  %v737_v11 = vmul.f32 %v458_v9, %v458_v9  ;;  %v689_v12 = vsel %vm475_vm0, %v673_v5, 0.0  ;;  %v695_v13 = vsel %vm475_vm0, %v675_v7, 0.0  ;;  %v692_v17 = vsel %vm475_vm0, %v674_v8, 0.0  ;;  %v467_v27 = vld [vmem:[%s2378_s18 + $0x40] sm:$0xff]  ;;  %v468_v28 = vld [vmem:[%s2378_s18 + $0x48] sm:$0xff]  ;;  %v469_v33 = vld [vmem:[%s2378_s18 + $0x50] sm:$0xff]  ;;  %s2508_s24 = scalar_lea.vmem %s3185_s3, %s1784_s2 }
  0x3b   : > { %1857 = vmatpush3.msk.msra.mxu1 %vm524_vm1, %v458_v9  ;;  %690 = vadd.xlane.f32.xlu0 %v689_v12  ;;  %v698_v19 = vsel %vm475_vm0, %v676_v10, 0.0  ;;  %v701_v23 = vsel %vm475_vm0, %v677_v18, 0.0  ;;  %v679_v24 = vmul.f32 %v465_v21, %v465_v21  ;;  %v704_v25 = vsel %vm475_vm0, %v678_v20, 0.0  ;;  %v470_v34 = vld [vmem:[%s2378_s18 + $0x58] sm:$0xff]  ;;  %v471_v39 = vld [vmem:[%s2378_s18 + $0x60] sm:$0xff]  ;;  %v472_v40 = vld [vmem:[%s2378_s18 + $0x68] sm:$0xff] }
  0x3c   : > { %v2394_v15 = vsel %vm524_vm1, %v737_v11, 0.0  ;;  %1859 = vmatmul.mubr.msk.f32.vlgmr.msra.gmra.mrb[0].mxu1 %vm475_vm0, %v460_v3  ;;  %696 = vadd.xlane.f32.xlu1 %v695_v13  ;;  %v680_v26 = vmul.f32 %v466_v22, %v466_v22  ;;  %v681_v30 = vmul.f32 %v467_v27, %v467_v27  ;;  %v682_v32 = vmul.f32 %v468_v28, %v468_v28  ;;  %v473_v45 = vld [vmem:[%s2378_s18 + $0x70] sm:$0xff]  ;;  %v474_v46 = vld [vmem:[%s2378_s18 + $0x78] sm:$0xff]  ;;  %s389_s18 = scalar_lea.vmem [#allocation2], %s1733_s17  ;;  %s1600_s17 = sshll.u32 %s439_s27, 4  ;;  %s3123_s17 = int_to_ptr.vmem [resolvable:$true] %s1600_s17 }
  0x3d   : > { %1861 = vmatprep.mubr.msk.f32.mxu1 %vm475_vm0, %v461_v4  ;;  %v707_v29 = vsel %vm475_vm0, %v679_v24, 0.0  ;;  %v683_v36 = vmul.f32 %v469_v33, %v469_v33  ;;  %v684_v38 = vmul.f32 %v470_v34, %v470_v34  ;;  %v685_v42 = vmul.f32 %v471_v39, %v471_v39  ;;  %s2131_s26 = scalar_lea.vmem %s3123_s17, 512  ;;  %s2228_s2 = smov [#allocation3]  }
  0x3e   : > { %v710_v31 = vsel %vm475_vm0, %v680_v26, 0.0  ;;  %v713_v35 = vsel %vm475_vm0, %v681_v30, 0.0  ;;  %v716_v37 = vsel %vm475_vm0, %v682_v32, 0.0  ;;  %v686_v44 = vmul.f32 %v472_v40, %v472_v40  ;;  %p2132_p3 = scmp.ne.s32.totalorder %s3123_s17, %s2131_s26  ;;  %s2135_s20 = sshll.u32 %s2228_s2, 4  ;;  %s2136_s20 = int_to_ptr.vmem [resolvable:$false] %s2135_s20 }
  0x3f   : > { %693 = vadd.xlane.f32.xlu0 %v692_v17  ;;  %v719_v41 = vsel %vm475_vm0, %v683_v36, 0.0  ;;  %v722_v43 = vsel %vm475_vm0, %v684_v38, 0.0  ;;  %v725_v47 = vsel %vm475_vm0, %v685_v42, 0.0  ;;  %v687_v48 = vmul.f32 %v473_v45, %v473_v45  ;;  %s2137_s22 = scalar_lea.vmem %s2136_s20, 1024  ;;  %p2138_p6 = scmp.lt.s32.totalorder %s3123_s17, %s2136_s20 }
  0x40   : > { %1862 = vmatmul.mubr.msk.f32.gmra.mrb[2].mxu1 %vm475_vm0, %v462_v6  ;;  %699 = vadd.xlane.f32.xlu1 %v698_v19  ;;  %v728_v49 = vsel %vm475_vm0, %v686_v44, 0.0  ;;  %v688_v50 = vmul.f32 %v474_v46, %v474_v46  ;;  %v739_v53 = vrot.slane %v2394_v15, 4  ;;  %p2133_p4 = pnand %p2132_p3, %p2342_p8  ;;  %p2139_p7 = scmp.lt.s32.totalorder %s2137_s22, %s2131_s26 }
  0x41   : > { %1864 = vmatprep.mubr.msk.f32.mxu1 %vm475_vm0, %v463_v14  ;;  %v731_v51 = vsel %vm475_vm0, %v687_v48, 0.0 }
  0x42   : > { %v734_v52 = vsel %vm475_vm0, %v688_v50, 0.0  ;;  %v740_v54 = vadd.f32 %v739_v53, %v2394_v15  ;;  %p2134_p5 = pneg %p2133_p4  ;;  %p2140_p10 = por %p2139_p7, %p2138_p6 }
  0x43   : > { %702 = vadd.xlane.f32.xlu0 %v701_v23 }
  0x44   : > { %1865 = vmatmul.mubr.msk.f32.gmra.mrb[4].mxu1 %vm475_vm0, %v464_v16  ;;  %705 = vadd.xlane.f32.xlu1 %v704_v25  ;;  %v741_v56 = vrot.slane %v740_v54, 2  ;;  %p2141_p11 = pnand %p2140_p10, %p2134_p5 }
  0x45   : > { %1867 = vmatprep.mubr.msk.f32.mxu1 %vm475_vm0, %v465_v21 }
  0x46   : > { %v742_v58 = vadd.f32 %v741_v56, %v740_v54 }
  0x47   : > { %708 = vadd.xlane.f32.xlu0 %v707_v29 }
  0x48   : > { %1868 = vmatmul.mubr.msk.f32.gmra.mrb[6].mxu1 %vm475_vm0, %v466_v22  ;;  %711 = vadd.xlane.f32.xlu1 %v710_v31  ;;  %v743_v60 = vrot.slane %v742_v58, 1 }
  0x49   : > { %1870 = vmatprep.mubr.msk.f32.mxu1 %vm475_vm0, %v467_v27 }
  0x4a   : > { %v2438_v63 = vadd.f32 %v743_v60, %v742_v58 }
  0x4b   : > { %714 = vadd.xlane.f32.xlu0 %v713_v35 }
  0x4c   : > { %1871 = vmatmul.mubr.msk.f32.gmra.mrb[8].mxu1 %vm475_vm0, %v468_v28  ;;  %717 = vadd.xlane.f32.xlu1 %v716_v37 }
  0x4d   : > { %1873 = vmatprep.mubr.msk.f32.mxu1 %vm475_vm0, %v469_v33 }
  0x4f   : > { %720 = vadd.xlane.f32.xlu0 %v719_v41 }
  0x50   : > { %1874 = vmatmul.mubr.msk.f32.gmra.mrb[10].mxu1 %vm475_vm0, %v470_v34  ;;  %723 = vadd.xlane.f32.xlu1 %v722_v43 }
  0x51   : > { %1876 = vmatprep.mubr.msk.f32.mxu1 %vm475_vm0, %v471_v39 }
  0x53   : > { %726 = vadd.xlane.f32.xlu0 %v725_v47 }
  0x54   : > { %1877 = vmatmul.mubr.msk.f32.gmra.mrb[12].mxu1 %vm475_vm0, %v472_v40  ;;  %729 = vadd.xlane.f32.xlu1 %v728_v49 }
  0x55   : > { %1879 = vmatprep.mubr.msk.f32.mxu1 %vm475_vm0, %v473_v45 }
  0x57   : > { %732 = vadd.xlane.f32.xlu0 %v731_v51 }
  0x58   : > { %1880 = vmatmul.mubr.msk.f32.gmra.mrb[14].mxu1 %vm475_vm0, %v474_v46  ;;  %735 = vadd.xlane.f32.xlu1 %v734_v52 }
  0xc8   : > { %v691_v57 = vpop.xlane.xlu0 %690 }
  0xc9   : > { %v697_v55 = vpop.xlane.xlu1 %696  ;;  %v745_v2 = vadd.f32 %v2438_v63, %v691_v57 }
  0xca   : > { %v747_v15 = vadd.f32 %v2438_v63, %v697_v55 }
  0xcc   : > { %v694_v61 = vpop.xlane.xlu0 %693 }
  0xcd   : > { %v700_v59 = vpop.xlane.xlu1 %699  ;;  %v746_v1 = vadd.f32 %v2438_v63, %v694_v61 }
  0xce   : > { %v748_v10 = vadd.f32 %v2438_v63, %v700_v59 }
  0xd0   : > { %v703_v0 = vpop.xlane.xlu0 %702 }
  0xd1   : > { %v706_v62 = vpop.xlane.xlu1 %705  ;;  %v749_v23 = vadd.f32 %v2438_v63, %v703_v0 }
  0xd2   : > { %v750_v19 = vadd.f32 %v2438_v63, %v706_v62 }
  0xd4   : > { %v709_v7 = vpop.xlane.xlu0 %708 }
  0xd5   : > { %v712_v4 = vpop.xlane.xlu1 %711  ;;  %v751_v31 = vadd.f32 %v2438_v63, %v709_v7 }
  0xd6   : > { %v752_v28 = vadd.f32 %v2438_v63, %v712_v4 }
  0xd8   : > { %v715_v20 = vpop.xlane.xlu0 %714 }
  0xd9   : > { %v718_v17 = vpop.xlane.xlu1 %717  ;;  %v753_v43 = vadd.f32 %v2438_v63, %v715_v20 }
  0xda   : > { %v754_v40 = vadd.f32 %v2438_v63, %v718_v17 }
  0xdc   : > { %v721_v36 = vpop.xlane.xlu0 %720 }
  0xdd   : > { %v724_v32 = vpop.xlane.xlu1 %723  ;;  %v755_v55 = vadd.f32 %v2438_v63, %v721_v36 }
  0xde   : > { %v756_v51 = vadd.f32 %v2438_v63, %v724_v32 }
  0xe0   : > { %v727_v52 = vpop.xlane.xlu0 %726 }
  0xe1   : > { %v730_v49 = vpop.xlane.xlu1 %729 }
  0xe2   : > { %v758_v62 = vadd.f32 %v2438_v63, %v730_v49 }
  0xe4   : > { %v733_v7 = vpop.xlane.xlu0 %732 }
 0x10f   : > { %v1860_v3 = vpop.f32.mrb[0].mxu1 }
 0x110   : > { %v762_v5 = vmul.f32 2.0, %v1860_v3  ;;  %v594_v6 = vpop.f32.mrb[1].mxu1  ;;  %v736_v3 = vpop.xlane.xlu1 %735 }
 0x111   : > { %v761_v8 = vmul.f32 2.0, %v594_v6 }
 0x112   : > { %v2442_v9 = vsub.f32 %v746_v1, %v762_v5 }
 0x113   : > { %v2445_v11 = vsub.f32 %v745_v2, %v761_v8  ;;  %v1863_v12 = vpop.f32.mrb[2].mxu1  ;;  %v757_v2 = vadd.f32 %v2438_v63, %v727_v52 }
 0x114   : > { %v764_v13 = vmul.f32 2.0, %v1863_v12  ;;  %v604_v14 = vpop.f32.mrb[3].mxu1 }
 0x115   : > { %v763_v16 = vmul.f32 2.0, %v604_v14 }
 0x116   : > { %v2448_v18 = vsub.f32 %v748_v10, %v764_v13  ;;  %v760_v13 = vadd.f32 %v2438_v63, %v736_v3 }
 0x117   : > { %v2451_v21 = vsub.f32 %v747_v15, %v763_v16  ;;  %v1866_v22 = vpop.f32.mrb[4].mxu1  ;;  %v759_v16 = vadd.f32 %v2438_v63, %v733_v7  ;;  %v1014_v63 = vld [vmem:[%s2508_s24] sm:$0xff] }
 0x118   : > { %v766_v24 = vmul.f32 2.0, %v1866_v22  ;;  %v614_v25 = vpop.f32.mrb[5].mxu1  ;;  %1914 = vmatprep.mubr.f32.mxu1 %v1014_v63 }
 0x119   : > { %v765_v26 = vmul.f32 2.0, %v614_v25 }
 0x11a   : > { %v2454_v27 = vsub.f32 %v750_v19, %v766_v24 }
 0x11b   : > { %v2457_v29 = vsub.f32 %v749_v23, %v765_v26  ;;  %v1869_v30 = vpop.f32.mrb[6].mxu1 }
 0x11c   : > { %v794_v33 = vmin.f32 %v2442_v9, %v2454_v27  ;;  %v768_v34 = vmul.f32 2.0, %v1869_v30  ;;  %v624_v35 = vpop.f32.mrb[7].mxu1 }
 0x11d   : > { %v793_v37 = vmin.f32 %v2445_v11, %v2457_v29  ;;  %v767_v38 = vmul.f32 2.0, %v624_v35 }
 0x11e   : > { %v2464_v39 = vsub.f32 %v752_v28, %v768_v34 }
 0x11f   : > { %v2467_v41 = vsub.f32 %v751_v31, %v767_v38  ;;  %v1872_v42 = vpop.f32.mrb[8].mxu1 }
 0x120   : > { %v796_v44 = vmin.f32 %v2448_v18, %v2464_v39  ;;  %v770_v45 = vmul.f32 2.0, %v1872_v42  ;;  %v634_v46 = vpop.f32.mrb[9].mxu1 }
 0x121   : > { %v795_v47 = vmin.f32 %v2451_v21, %v2467_v41  ;;  %v769_v48 = vmul.f32 2.0, %v634_v46 }
 0x122   : > { %v2474_v50 = vsub.f32 %v754_v40, %v770_v45 }
 0x123   : > { %v2477_v53 = vsub.f32 %v753_v43, %v769_v48  ;;  %v1875_v54 = vpop.f32.mrb[10].mxu1 }
 0x124   : > { %v798_v56 = vmin.f32 %v794_v33, %v2474_v50  ;;  %v772_v57 = vmul.f32 2.0, %v1875_v54  ;;  %v644_v58 = vpop.f32.mrb[11].mxu1 }
 0x125   : > { %v797_v59 = vmin.f32 %v793_v37, %v2477_v53  ;;  %v771_v60 = vmul.f32 2.0, %v644_v58 }
 0x126   : > { %v2482_v61 = vsub.f32 %v756_v51, %v772_v57 }
 0x127   : > { %v2485_v0 = vsub.f32 %v755_v55, %v771_v60  ;;  %v1878_v1 = vpop.f32.mrb[12].mxu1 }
 0x128   : > { %v800_v4 = vmin.f32 %v796_v44, %v2482_v61  ;;  %v774_v5 = vmul.f32 2.0, %v1878_v1  ;;  %v654_v6 = vpop.f32.mrb[13].mxu1 }
 0x129   : > { %v799_v8 = vmin.f32 %v795_v47, %v2485_v0  ;;  %v773_v10 = vmul.f32 2.0, %v654_v6 }
 0x12a   : > { %v2490_v12 = vsub.f32 %v758_v62, %v774_v5 }
 0x12b   : > { %v2493_v14 = vsub.f32 %v757_v2, %v773_v10  ;;  %v1881_v15 = vpop.f32.mrb[14].mxu1 }
 0x12c   : > { %v802_v17 = vmin.f32 %v798_v56, %v2490_v12  ;;  %v776_v19 = vmul.f32 2.0, %v1881_v15  ;;  %v664_v20 = vpop.f32.mrb[15].mxu1 }
 0x12d   : > { %v801_v22 = vmin.f32 %v797_v59, %v2493_v14  ;;  %v775_v23 = vmul.f32 2.0, %v664_v20 }
 0x12e   : > { %v2498_v24 = vsub.f32 %v760_v13, %v776_v19 }
 0x12f   : > { %v805_v25 = vmin.f32 %v801_v22, %v802_v17  ;;  %v2500_v26 = vsub.f32 %v759_v16, %v775_v23 }
 0x130   : > { %v804_v28 = vmin.f32 %v800_v4, %v2498_v24 }
 0x131   : > { %v803_v30 = vmin.f32 %v799_v8, %v2500_v26 }
 0x133   : > { %v806_v31 = vmin.f32 %v803_v30, %v804_v28 }
 0x135   : > { %v807_v32 = vmin.f32 %v805_v25, %v806_v31 }
 0x137   : > { %v808_v33 = vrot.slane %v807_v32, 4 }
 0x139   : > { %v809_v34 = vmin.f32 %v807_v32, %v808_v33 }
 0x13b   : > { %v810_v35 = vrot.slane %v809_v34, 2 }
 0x13d   : > { %v811_v36 = vmin.f32 %v809_v34, %v810_v35 }
 0x13f   : > { %v812_v37 = vrot.slane %v811_v36, 1 }
 0x141   : > { %v2511_v38 = vmin.f32 %v811_v36, %v812_v37 }
 0x143   : > { %vm814_vm2 = vcmp.eq.f32.partialorder %v2445_v11, %v2511_v38  ;;  %vm815_vm3 = vcmp.eq.f32.partialorder %v2442_v9, %v2511_v38  ;;  %vm816_vm4 = vcmp.eq.f32.partialorder %v2451_v21, %v2511_v38  ;;  %vm817_vm5 = vcmp.eq.f32.partialorder %v2448_v18, %v2511_v38 }
 0x144   : > { %vm818_vm6 = vcmp.eq.f32.partialorder %v2457_v29, %v2511_v38  ;;  %vm819_vm7 = vcmp.eq.f32.partialorder %v2454_v27, %v2511_v38  ;;  %vm820_vm8 = vcmp.eq.f32.partialorder %v2467_v41, %v2511_v38  ;;  %vm821_vm9 = vcmp.eq.f32.partialorder %v2464_v39, %v2511_v38 }
 0x145   : > { %vm822_vm10 = vcmp.eq.f32.partialorder %v2477_v53, %v2511_v38  ;;  %vm823_vm11 = vcmp.eq.f32.partialorder %v2474_v50, %v2511_v38  ;;  %vm824_vm12 = vcmp.eq.f32.partialorder %v2485_v0, %v2511_v38  ;;  %vm825_vm13 = vcmp.eq.f32.partialorder %v2482_v61, %v2511_v38 }
 0x146   : > { %vm826_vm14 = vcmp.eq.f32.partialorder %v2493_v14, %v2511_v38  ;;  %vm827_vm15 = vcmp.eq.f32.partialorder %v2490_v12, %v2511_v38  ;;  %vm828_vm0 = vcmp.eq.f32.partialorder %v2500_v26, %v2511_v38  ;;  %vm829_vm1 = vcmp.eq.f32.partialorder %v2498_v24, %v2511_v38 }
 0x147   : > { %v830_v40 = vadd.f32 1e-08, %v2511_v38  ;;  %v2550_v42 = vsel %vm814_vm2, 1e+30, %v2445_v11  ;;  %v2556_v43 = vsel %vm815_vm3, 1e+30, %v2442_v9 }
 0x148   : > { %v2562_v44 = vsel %vm816_vm4, 1e+30, %v2451_v21  ;;  %v2568_v45 = vsel %vm817_vm5, 1e+30, %v2448_v18  ;;  %v2574_v46 = vsel %vm818_vm6, 1e+30, %v2457_v29 }
 0x149   : > { %2123 = vrcp.f32 %v830_v40  ;;  %v2580_v47 = vsel %vm819_vm7, 1e+30, %v2454_v27  ;;  %v2586_v48 = vsel %vm820_vm8, 1e+30, %v2467_v41  ;;  %v2592_v49 = vsel %vm821_vm9, 1e+30, %v2464_v39 }
 0x14a   : > { %v2598_v51 = vsel %vm822_vm10, 1e+30, %v2477_v53  ;;  %v2604_v52 = vsel %vm823_vm11, 1e+30, %v2474_v50  ;;  %v2610_v54 = vsel %vm824_vm12, 1e+30, %v2485_v0  ;;  %v865_v55 = vmin.f32 %v2550_v42, %v2574_v46 }
 0x14b   : > { %v2618_v56 = vsel %vm825_vm13, 1e+30, %v2482_v61  ;;  %v2624_v57 = vsel %vm826_vm14, 1e+30, %v2493_v14  ;;  %v2630_v58 = vsel %vm827_vm15, 1e+30, %v2490_v12  ;;  %v866_v59 = vmin.f32 %v2556_v43, %v2580_v47 }
 0x14c   : > { %v2638_v60 = vsel %vm828_vm0, 1e+30, %v2500_v26  ;;  %v2644_v62 = vsel %vm829_vm1, 1e+30, %v2498_v24  ;;  %v867_v1 = vmin.f32 %v2562_v44, %v2586_v48  ;;  %v868_v2 = vmin.f32 %v2568_v45, %v2592_v49 }
 0x14d   : > { %v869_v3 = vmin.f32 %v865_v55, %v2598_v51  ;;  %v870_v4 = vmin.f32 %v866_v59, %v2604_v52 }
 0x14e   : > { %v871_v5 = vmin.f32 %v867_v1, %v2610_v54  ;;  %v872_v6 = vmin.f32 %v868_v2, %v2618_v56 }
 0x14f   : > { %v873_v7 = vmin.f32 %v869_v3, %v2624_v57  ;;  %v874_v8 = vmin.f32 %v870_v4, %v2630_v58 }
 0x150   : > { %v875_v10 = vmin.f32 %v871_v5, %v2638_v60  ;;  %v876_v13 = vmin.f32 %v872_v6, %v2644_v62 }
 0x151   : > { %v877_v15 = vmin.f32 %v873_v7, %v874_v8 }
 0x152   : > { %v878_v16 = vmin.f32 %v875_v10, %v876_v13 }
 0x153   : > { %v2124_v17 = vpop.eup %2123 }
 0x154   : > { %v2661_v19 = vsel %vm828_vm0, %v2124_v17, 0.0  ;;  %v879_v20 = vmin.f32 %v877_v15, %v878_v16  ;;  %v2666_v22 = vsel %vm814_vm2, %v2124_v17, 0.0  ;;  %v2671_v23 = vsel %vm815_vm3, %v2124_v17, 0.0 }
 0x155   : > { %v2676_v25 = vsel %vm816_vm4, %v2124_v17, 0.0  ;;  %v2681_v26 = vsel %vm817_vm5, %v2124_v17, 0.0  ;;  %v2686_v11 = vsel %vm818_vm6, %v2124_v17, 0.0  ;;  %v2691_v9 = vsel %vm819_vm7, %v2124_v17, 0.0 }
 0x156   : > { %v880_v28 = vrot.slane %v879_v20, 4  ;;  %v2696_v21 = vsel %vm820_vm8, %v2124_v17, 0.0  ;;  %v2701_v18 = vsel %vm821_vm9, %v2124_v17, 0.0  ;;  %v2706_v29 = vsel %vm822_vm10, %v2124_v17, 0.0 }
 0x157   : > { %v2711_v27 = vsel %vm823_vm11, %v2124_v17, 0.0  ;;  %v2716_v41 = vsel %vm824_vm12, %v2124_v17, 0.0  ;;  %v2721_v39 = vsel %vm825_vm13, %v2124_v17, 0.0  ;;  %v2726_v53 = vsel %vm826_vm14, %v2124_v17, 0.0 }
 0x158   : > { %v881_v30 = vmin.f32 %v879_v20, %v880_v28  ;;  %v2731_v50 = vsel %vm827_vm15, %v2124_v17, 0.0  ;;  %v2736_v0 = vsel %vm829_vm1, %v2124_v17, 0.0 }
 0x15a   : > { %v882_v31 = vrot.slane %v881_v30, 2 }
 0x15c   : > { %v883_v61 = vmin.f32 %v881_v30, %v882_v31 }
 0x15e   : > { %v884_v32 = vrot.slane %v883_v61, 1 }
 0x160   : > { %v2738_v63 = vmin.f32 %v883_v61, %v884_v32 }
 0x162   : > { %vm888_vm2 = vcmp.eq.f32.partialorder %v2562_v44, %v2738_v63  ;;  %vm889_vm3 = vcmp.eq.f32.partialorder %v2568_v45, %v2738_v63  ;;  %vm892_vm4 = vcmp.eq.f32.partialorder %v2586_v48, %v2738_v63  ;;  %vm893_vm5 = vcmp.eq.f32.partialorder %v2592_v49, %v2738_v63 }
 0x163   : > { %vm896_vm6 = vcmp.eq.f32.partialorder %v2610_v54, %v2738_v63  ;;  %vm897_vm7 = vcmp.eq.f32.partialorder %v2618_v56, %v2738_v63  ;;  %vm900_vm8 = vcmp.eq.f32.partialorder %v2638_v60, %v2738_v63  ;;  %vm901_vm9 = vcmp.eq.f32.partialorder %v2644_v62, %v2738_v63 }
 0x164   : > { %v902_v12 = vadd.f32 1e-08, %v2738_v63  ;;  %v2761_v14 = vsel %vm888_vm2, 1e+30, %v2562_v44  ;;  %v2767_v24 = vsel %vm889_vm3, 1e+30, %v2568_v45  ;;  %vm886_vm10 = vcmp.eq.f32.partialorder %v2550_v42, %v2738_v63 }
 0x165   : > { %v2775_v33 = vsel %vm892_vm4, 1e+30, %v2586_v48  ;;  %v2781_v34 = vsel %vm893_vm5, 1e+30, %v2592_v49  ;;  %v2787_v35 = vsel %vm896_vm6, 1e+30, %v2610_v54  ;;  %vm887_vm11 = vcmp.eq.f32.partialorder %v2556_v43, %v2738_v63 }
 0x166   : > { %2125 = vrcp.f32 %v902_v12  ;;  %v2795_v36 = vsel %vm897_vm7, 1e+30, %v2618_v56  ;;  %v2801_v37 = vsel %vm900_vm8, 1e+30, %v2638_v60  ;;  %v2807_v38 = vsel %vm901_vm9, 1e+30, %v2644_v62 }
 0x167   : > { %v939_v40 = vmin.f32 %v2761_v14, %v2775_v33  ;;  %v940_v55 = vmin.f32 %v2767_v24, %v2781_v34  ;;  %vm890_vm12 = vcmp.eq.f32.partialorder %v2574_v46, %v2738_v63  ;;  %vm891_vm13 = vcmp.eq.f32.partialorder %v2580_v47, %v2738_v63 }
 0x168   : > { %vm894_vm14 = vcmp.eq.f32.partialorder %v2598_v51, %v2738_v63  ;;  %vm895_vm15 = vcmp.eq.f32.partialorder %v2604_v52, %v2738_v63  ;;  %vm898_vm0 = vcmp.eq.f32.partialorder %v2624_v57, %v2738_v63  ;;  %vm899_vm1 = vcmp.eq.f32.partialorder %v2630_v58, %v2738_v63 }
 0x169   : > { %v943_v59 = vmin.f32 %v939_v40, %v2787_v35  ;;  %v944_v1 = vmin.f32 %v940_v55, %v2795_v36  ;;  %v2831_v2 = vsel %vm886_vm10, 1e+30, %v2550_v42  ;;  %v2837_v3 = vsel %vm887_vm11, 1e+30, %v2556_v43 }
 0x16a   : > { %v2843_v4 = vsel %vm890_vm12, 1e+30, %v2574_v46  ;;  %v2849_v5 = vsel %vm891_vm13, 1e+30, %v2580_v47  ;;  %v2855_v6 = vsel %vm894_vm14, 1e+30, %v2598_v51 }
 0x16b   : > { %v947_v7 = vmin.f32 %v943_v59, %v2801_v37  ;;  %v948_v8 = vmin.f32 %v944_v1, %v2807_v38  ;;  %v2863_v10 = vsel %vm895_vm15, 1e+30, %v2604_v52  ;;  %v2869_v13 = vsel %vm898_vm0, 1e+30, %v2624_v57 }
 0x16c   : > { %v2875_v15 = vsel %vm899_vm1, 1e+30, %v2630_v58  ;;  %v937_v16 = vmin.f32 %v2831_v2, %v2843_v4  ;;  %v938_v17 = vmin.f32 %v2837_v3, %v2849_v5 }
 0x16d   : > { %v950_v20 = vmin.f32 %v947_v7, %v948_v8 }
 0x16e   : > { %v941_v28 = vmin.f32 %v937_v16, %v2855_v6  ;;  %v942_v30 = vmin.f32 %v938_v17, %v2863_v10 }
 0x170   : > { %v2126_v31 = vpop.eup %2125  ;;  %v945_v61 = vmin.f32 %v941_v28, %v2869_v13  ;;  %v946_v32 = vmin.f32 %v942_v30, %v2875_v15 }
 0x171   : > { %v905_v12 = vsel %vm886_vm10, %v2126_v31, %v2666_v22  ;;  %v906_v40 = vsel %vm887_vm11, %v2126_v31, %v2671_v23  ;;  %v907_v55 = vsel %vm888_vm2, %v2126_v31, %v2676_v25  ;;  %v908_v59 = vsel %vm889_vm3, %v2126_v31, %v2681_v26 }
 0x172   : > { %v949_v1 = vmin.f32 %v945_v61, %v946_v32  ;;  %v909_v42 = vsel %vm890_vm12, %v2126_v31, %v2686_v11  ;;  %v910_v43 = vsel %vm891_vm13, %v2126_v31, %v2691_v9  ;;  %v911_v44 = vsel %vm892_vm4, %v2126_v31, %v2696_v21 }
 0x173   : > { %v912_v45 = vsel %vm893_vm5, %v2126_v31, %v2701_v18  ;;  %v913_v46 = vsel %vm894_vm14, %v2126_v31, %v2706_v29  ;;  %v914_v47 = vsel %vm895_vm15, %v2126_v31, %v2711_v27  ;;  %v915_v48 = vsel %vm896_vm6, %v2126_v31, %v2716_v41 }
 0x174   : > { %v951_v22 = vmin.f32 %v949_v1, %v950_v20  ;;  %v916_v49 = vsel %vm897_vm7, %v2126_v31, %v2721_v39  ;;  %v917_v51 = vsel %vm898_vm0, %v2126_v31, %v2726_v53  ;;  %v918_v52 = vsel %vm899_vm1, %v2126_v31, %v2731_v50  ;;  %v1119_v1 = vld [vmem:[%s3187_s5] sm:$0xff] }
 0x175   : > { %v919_v54 = vsel %vm900_vm8, %v2126_v31, %v2661_v19  ;;  %v920_v56 = vsel %vm901_vm9, %v2126_v31, %v2736_v0 }
 0x176   : > { %v952_v23 = vrot.slane %v951_v22, 4 }
 0x178   : > { %v953_v25 = vmin.f32 %v951_v22, %v952_v23  ;;  %v1391_v22 = vld [vmem:[%s3188_s6 + $0x20] sm:$0xff] }
 0x17a   : > { %v954_v26 = vrot.slane %v953_v25, 2 }
 0x17c   : > { %v955_v57 = vmin.f32 %v953_v25, %v954_v26 }
 0x17e   : > { %v956_v11 = vrot.slane %v955_v57, 1 }
 0x180   : > { %v957_v9 = vmin.f32 %v955_v57, %v956_v11 }
 0x182   : > { %vm958_vm2 = vcmp.eq.f32.partialorder %v2831_v2, %v957_v9  ;;  %vm959_vm3 = vcmp.eq.f32.partialorder %v2837_v3, %v957_v9  ;;  %v974_v58 = vadd.f32 1e-08, %v957_v9  ;;  %vm960_vm4 = vcmp.eq.f32.partialorder %v2761_v14, %v957_v9 }
 0x183   : > { %vm961_vm5 = vcmp.eq.f32.partialorder %v2767_v24, %v957_v9  ;;  %vm962_vm6 = vcmp.eq.f32.partialorder %v2843_v4, %v957_v9  ;;  %vm963_vm7 = vcmp.eq.f32.partialorder %v2849_v5, %v957_v9  ;;  %vm964_vm8 = vcmp.eq.f32.partialorder %v2775_v33, %v957_v9 }
 0x184   : > { %2127 = vrcp.f32 %v974_v58  ;;  %vm965_vm9 = vcmp.eq.f32.partialorder %v2781_v34, %v957_v9  ;;  %vm966_vm10 = vcmp.eq.f32.partialorder %v2855_v6, %v957_v9  ;;  %vm967_vm11 = vcmp.eq.f32.partialorder %v2863_v10, %v957_v9 }
 0x185   : > { %vm968_vm12 = vcmp.eq.f32.partialorder %v2787_v35, %v957_v9  ;;  %vm969_vm13 = vcmp.eq.f32.partialorder %v2795_v36, %v957_v9  ;;  %vm970_vm14 = vcmp.eq.f32.partialorder %v2869_v13, %v957_v9  ;;  %vm971_vm15 = vcmp.eq.f32.partialorder %v2875_v15, %v957_v9 }
 0x186   : > { %vm972_vm0 = vcmp.eq.f32.partialorder %v2801_v37, %v957_v9  ;;  %vm973_vm1 = vcmp.eq.f32.partialorder %v2807_v38, %v957_v9 }
 0x18e   : > { %v2128_v60 = vpop.eup %2127 }
 0x18f   : > { %v977_v62 = vsel %vm958_vm2, %v2128_v60, %v905_v12  ;;  %v978_v19 = vsel %vm959_vm3, %v2128_v60, %v906_v40  ;;  %v979_v21 = vsel %vm960_vm4, %v2128_v60, %v907_v55  ;;  %v980_v18 = vsel %vm961_vm5, %v2128_v60, %v908_v59  ;;  %v1015_v40 = vld [vmem:[%s2508_s24 + $0x8] sm:$0xff]  ;;  %v1016_v55 = vld [vmem:[%s2508_s24 + $0x10] sm:$0xff]  ;;  %v1017_v59 = vld [vmem:[%s2508_s24 + $0x18] sm:$0xff]  ;;  %s1779_s24 = sshll.u32 %s2213_s13, 4 }
 0x190   : > { %v993_v29 = vadd.f32 %v978_v19, %v977_v62  ;;  %v1978_v27 = vpack.c.bf16 %v978_v19, %v977_v62  ;;  %v1982_v41 = vpack.c.bf16 %v980_v18, %v979_v21  ;;  %v981_v39 = vsel %vm962_vm6, %v2128_v60, %v909_v42  ;;  %v1388_v42 = vld [vmem:[%s3188_s6 + $0x8] sm:$0xff]  ;;  %s1597_s19 = sadd.s32 %s2209_s12, %s1779_s24 }
 0x191   : > { %v982_v53 = vsel %vm963_vm7, %v2128_v60, %v910_v43  ;;  %v983_v50 = vsel %vm964_vm8, %v2128_v60, %v911_v44  ;;  %v984_v0 = vsel %vm965_vm9, %v2128_v60, %v912_v45  ;;  %v985_v63 = vsel %vm966_vm10, %v2128_v60, %v913_v46  ;;  %v1389_v44 = vld [vmem:[%s3188_s6 + $0x10] sm:$0xff]  ;;  %v1387_v45 = vld [vmem:[%s3188_s6] sm:$0xff]  ;;  %v1456_v46 = vld [vmem:[%s3190_s8 + $0x8] sm:$0xff] }
 0x192   : > { %1979 = vmatprep.subr.bf16.mxu1 %v1978_v27  ;;  %v994_v14 = vadd.f32 %v993_v29, %v979_v21  ;;  %v1986_v24 = vpack.c.bf16 %v982_v53, %v981_v39  ;;  %v1990_v2 = vpack.c.bf16 %v984_v0, %v983_v50  ;;  %v986_v3 = vsel %vm967_vm11, %v2128_v60, %v914_v47  ;;  %v1390_v47 = vld [vmem:[%s3188_s6 + $0x18] sm:$0xff] }
 0x193   : > { %1981 = vmatpush3.bf16.msra.mxu1 %v1978_v27  ;;  %v1994_v4 = vpack.c.bf16 %v986_v3, %v985_v63  ;;  %v987_v5 = vsel %vm968_vm12, %v2128_v60, %v915_v48  ;;  %v988_v33 = vsel %vm969_vm13, %v2128_v60, %v916_v49  ;;  %v989_v34 = vsel %vm970_vm14, %v2128_v60, %v917_v51  ;;  %v1458_v48 = vld [vmem:[%s3190_s8 + $0x18] sm:$0xff]  ;;  %v1392_v49 = vld [vmem:[%s3188_s6 + $0x28] sm:$0xff]  ;;  %v1393_v51 = vld [vmem:[%s3188_s6 + $0x30] sm:$0xff] }
 0x194   : > { %v995_v6 = vadd.f32 %v994_v14, %v980_v18  ;;  %1983 = vmatprep.subr.bf16.mxu1 %v1982_v41  ;;  %v1998_v7 = vpack.c.bf16 %v988_v33, %v987_v5  ;;  %v990_v8 = vsel %vm971_vm15, %v2128_v60, %v918_v52  ;;  %v991_v10 = vsel %vm972_vm0, %v2128_v60, %v919_v54  ;;  %v1394_v52 = vld [vmem:[%s3188_s6 + $0x38] sm:$0xff]  ;;  %v1455_v54 = vld [vmem:[%s3190_s8] sm:$0xff]  ;;  %v1120_v14 = vld [vmem:[%s3187_s5 + $0x8] sm:$0xff] }
 0x195   : > { %v2002_v16 = vpack.c.bf16 %v990_v8, %v989_v34  ;;  %v992_v35 = vsel %vm973_vm1, %v2128_v60, %v920_v56  ;;  %vm1127_vm2 = vcmask 261120   ;;  %v2227_v43 = vmov 0   ;;  %v1457_v56 = vld [vmem:[%s3190_s8 + $0x10] sm:$0xff] }
 0x196   : > { %v996_v17 = vadd.f32 %v995_v6, %v981_v39  ;;  %v2006_v20 = vpack.c.bf16 %v992_v35, %v991_v10  ;;  %1928 = vmatprep.mubr.msk.f32.mxu0 %vm1127_vm2, %v1119_v1  ;;  %2122 = vset.pattern.permute.xlu1 %v2227_v43  ;;  %v1117_v39 = vld [vmem:[%s389_s18] sm:$0xff]  ;;  %vm1257_vm3 = vcmask 130048   ;;  %v1110_v6 = vld [vmem:[%s3186_s4 + $0x8] sm:$0xff]  ;;  %vm1479_vm4 = vcmask 523264  }
 0x197   : > { %1985 = vmatpush3.bf16.msra.mxu1 %v1982_v41  ;;  %2121 = vset.pattern.permute.xlu0 %v2227_v43 }
 0x198   : > { %v997_v36 = vadd.f32 %v996_v17, %v982_v53  ;;  %1987 = vmatprep.subr.bf16.mxu1 %v1986_v24  ;;  %1402 = vperm.xlu1 %2122, %v1388_v42   ;;  %v1118_v53 = vld [vmem:[%s389_s18 + $0x8] sm:$0xff]  ;;  %s1780_s18 = sshll.u32 %s1597_s19, 7 }
 0x199   : > { %1397 = vperm.xlu0 %2121, %v1387_v45   ;;  %v1116_v17 = vld [vmem:[%s3186_s4 + $0x38] sm:$0xff]  ;;  %s3128_s21 = scalar_lea.hbm %s3191_s9, %s1780_s18 }
 0x19a   : > { %v998_v13 = vadd.f32 %v997_v36, %v983_v50 }
 0x19b   : > { %1989 = vmatpush3.bf16.msra.mxu1 %v1986_v24  ;;  %v1121_v24 = vld [vmem:[%s3187_s5 + $0x10] sm:$0xff] }
 0x19c   : > { %v999_v28 = vadd.f32 %v998_v13, %v984_v0  ;;  %1991 = vmatprep.subr.bf16.mxu1 %v1990_v2  ;;  %1407 = vperm.xlu1 %2122, %v1389_v44  }
 0x19d   : > { %1466 = vperm.xlu0 %2121, %v1456_v46  }
 0x19e   : > { %v1000_v30 = vadd.f32 %v999_v28, %v985_v63  ;;  %v2018_v63 = vpack.c.bf16 %v1118_v53, %v1117_v39 }
 0x19f   : > { %1993 = vmatpush3.bf16.msra.mxu1 %v1990_v2  ;;  %v1122_v2 = vld [vmem:[%s3187_s5 + $0x18] sm:$0xff] }
 0x1a0   : > { %v1001_v15 = vadd.f32 %v1000_v30, %v986_v3  ;;  %1995 = vmatprep.subr.bf16.mxu1 %v1994_v4  ;;  %1412 = vperm.xlu1 %2122, %v1390_v47   ;;  %v1123_v3 = vld [vmem:[%s3187_s5 + $0x20] sm:$0xff] }
 0x1a1   : > { %1476 = vperm.xlu0 %2121, %v1458_v48  }
 0x1a2   : > { %v1002_v37 = vadd.f32 %v1001_v15, %v987_v5  ;;  %v1125_v5 = vld [vmem:[%s3187_s5 + $0x30] sm:$0xff] }
 0x1a3   : > { %1997 = vmatpush3.bf16.msra.mxu1 %v1994_v4  ;;  %v1124_v4 = vld [vmem:[%s3187_s5 + $0x28] sm:$0xff] }
 0x1a4   : > { %v1003_v38 = vadd.f32 %v1002_v37, %v988_v33  ;;  %1999 = vmatprep.subr.bf16.mxu1 %v1998_v7  ;;  %1417 = vperm.xlu1 %2122, %v1391_v22   ;;  %v1126_v33 = vld [vmem:[%s3187_s5 + $0x38] sm:$0xff] }
 0x1a6   : > { %v1004_v31 = vadd.f32 %v1003_v38, %v989_v34  ;;  %v1109_v34 = vld [vmem:[%s3186_s4] sm:$0xff] }
 0x1a7   : > { %2001 = vmatpush3.bf16.msra.mxu1 %v1998_v7  ;;  %v1111_v7 = vld [vmem:[%s3186_s4 + $0x10] sm:$0xff] }
 0x1a8   : > { %v1005_v61 = vadd.f32 %v1004_v31, %v990_v8  ;;  %2003 = vmatprep.subr.bf16.mxu1 %v2002_v16  ;;  %1422 = vperm.xlu1 %2122, %v1392_v49   ;;  %v1112_v8 = vld [vmem:[%s3186_s4 + $0x18] sm:$0xff] }
 0x1aa   : > { %v1006_v32 = vadd.f32 %v1005_v61, %v991_v10  ;;  %v1113_v10 = vld [vmem:[%s3186_s4 + $0x20] sm:$0xff] }
 0x1ab   : > { %2005 = vmatpush3.bf16.msra.mxu1 %v2002_v16  ;;  %v1114_v16 = vld [vmem:[%s3186_s4 + $0x28] sm:$0xff] }
 0x1ac   : > { %v1007_v12 = vadd.f32 %v1006_v32, %v992_v35  ;;  %2007 = vmatprep.subr.bf16.mxu1 %v2006_v20  ;;  %1427 = vperm.xlu1 %2122, %v1393_v51   ;;  %v1115_v35 = vld [vmem:[%s3186_s4 + $0x30] sm:$0xff] }
 0x1ae   : > { %v1008_v23 = vrot.slane %v1007_v12, 4 }
 0x1af   : > { %2009 = vmatpush3.bf16.msra.mxu1 %v2006_v20  ;;  %v1451_v20 = vld [vmem:[%s3189_s7] sm:$0xff] }
 0x1b0   : > { %1432 = vperm.xlu1 %2122, %v1394_v52   ;;  %v1009_v25 = vadd.f32 %v1008_v23, %v1007_v12 }
 0x1b2   : > { %1915 = vmatmul.mubr.f32.vlgmr.msra.gmra.mrb[16].mxu1 %v1015_v40  ;;  %v1010_v26 = vrot.slane %v1009_v25, 2 }
 0x1b3   : > { %1917 = vmatprep.mubr.f32.mxu1 %v1016_v55 }
 0x1b4   : > { %1461 = vperm.xlu1 %2122, %v1455_v54   ;;  %v1011_v57 = vadd.f32 %v1010_v26, %v1009_v25 }
 0x1b6   : > { %1918 = vmatmul.mubr.f32.gmra.mrb[18].mxu1 %v1017_v59  ;;  %v1012_v11 = vrot.slane %v1011_v57, 1 }
 0x1b8   : > { %1471 = vperm.xlu1 %2122, %v1457_v56   ;;  %v1013_v9 = vadd.f32 %v1012_v11, %v1011_v57 }
 0x1ba   : > { %2129 = vrcp.f32 %v1013_v9 }
 0x1c4   : > { %v2130_v58 = vpop.eup %2129 }
 0x217   : > { %v1403_v36 = vpop.permute.xlu1 %1402 }
 0x218   : > { %v1398_v38 = vpop.permute.xlu0 %1397 }
 0x21b   : > { %v1408_v13 = vpop.permute.xlu1 %1407 }
 0x21f   : > { %v1413_v28 = vpop.permute.xlu1 %1412 }
 0x223   : > { %v1418_v30 = vpop.permute.xlu1 %1417 }
 0x227   : > { %v1423_v15 = vpop.permute.xlu1 %1422 }
 0x22b   : > { %v1428_v42 = vpop.permute.xlu1 %1427 }
 0x22f   : > { %v1433_v54 = vpop.permute.xlu1 %1432 }
 0x285   : > { %v1916_v60 = vpop.f32.mrb[16].mxu1 }
 0x286   : > { %v1106_v62 = vmul.f32 %v2130_v58, %v1916_v60  ;;  %v1084_v19 = vpop.f32.mrb[17].mxu1 }
 0x287   : > { %v1105_v21 = vmul.f32 %v2130_v58, %v1084_v19  ;;  %v1453_v19 = vld [vmem:[%s3189_s7 + $0x10] sm:$0xff] }
 0x289   : > { %v1919_v18 = vpop.f32.mrb[18].mxu1  ;;  %v2010_v29 = vpack.c.bf16 %v1106_v62, %v1105_v21  ;;  %v1452_v62 = vld [vmem:[%s3189_s7 + $0x8] sm:$0xff]  ;;  %v1454_v21 = vld [vmem:[%s3189_s7 + $0x18] sm:$0xff] }
 0x28a   : > { %v1108_v27 = vmul.f32 %v2130_v58, %v1919_v18  ;;  %v1094_v41 = vpop.f32.mrb[19].mxu1  ;;  %v1467_v18 = vpop.permute.xlu0 %1466 }
 0x28b   : > { %v1107_v50 = vmul.f32 %v2130_v58, %v1094_v41  ;;  %2011 = vmatprep.subr.bf16.mxu0 %v2010_v29 }
 0x28c   : > { %2013 = vmatpush3.bf16.msra.mxu0 %v2010_v29  ;;  %v1462_v29 = vpop.permute.xlu1 %1461 }
 0x28d   : > { %v2014_v0 = vpack.c.bf16 %v1108_v27, %v1107_v50 }
 0x28f   : > { %2015 = vmatprep.subr.bf16.mxu0 %v2014_v0 }
 0x290   : > { %2017 = vmatpush3.bf16.msra.mxu0 %v2014_v0  ;;  %v1477_v0 = vpop.permute.xlu0 %1476 }
 0x291   : > { %2019 = vmatprep.subr.bf16.mxu0 %v2018_v63 }
 0x293   : > { %1929 = vmatmul.mubr.msk.f32.vlgmr.msra.gmra.mrb[0].mxu0 %vm1127_vm2, %v1120_v14 }
 0x294   : > { %2021 = vmatpush3.bf16.msra.mxu0 %v2018_v63  ;;  %1931 = vmatprep.mubr.msk.f32.mxu0 %vm1127_vm2, %v1121_v24  ;;  %v1472_v24 = vpop.permute.xlu1 %1471 }
 0x297   : > { %1932 = vmatmul.mubr.msk.f32.gmra.mrb[2].mxu0 %vm1127_vm2, %v1122_v2 }
 0x298   : > { %1934 = vmatprep.mubr.msk.f32.mxu0 %vm1127_vm2, %v1123_v3 }
 0x29b   : > { %1935 = vmatmul.mubr.msk.f32.gmra.mrb[4].mxu0 %vm1127_vm2, %v1124_v4 }
 0x29c   : > { %1937 = vmatprep.mubr.msk.f32.mxu0 %vm1127_vm2, %v1125_v5 }
 0x29f   : > { %1938 = vmatmul.mubr.msk.f32.gmra.mrb[6].mxu0 %vm1127_vm2, %v1126_v33 }
 0x2a0   : > { %1944 = vmatprep.mubr.msk.f32.mxu0 %vm1257_vm3, %v1109_v34 }
 0x2a3   : > { %1945 = vmatmul.mubr.msk.f32.vlgmr.msra.gmra.mrb[0].mxu0 %vm1257_vm3, %v1110_v6 }
 0x2a4   : > { %1947 = vmatprep.mubr.msk.f32.mxu0 %vm1257_vm3, %v1111_v7 }
 0x2a7   : > { %1948 = vmatmul.mubr.msk.f32.gmra.mrb[2].mxu0 %vm1257_vm3, %v1112_v8 }
 0x2a8   : > { %1950 = vmatprep.mubr.msk.f32.mxu0 %vm1257_vm3, %v1113_v10 }
 0x2ab   : > { %1951 = vmatmul.mubr.msk.f32.gmra.mrb[4].mxu0 %vm1257_vm3, %v1114_v16 }
 0x2ac   : > { %1953 = vmatprep.mubr.msk.f32.mxu0 %vm1257_vm3, %v1115_v35 }
 0x2af   : > { %1954 = vmatmul.mubr.msk.f32.gmra.mrb[6].mxu0 %vm1257_vm3, %v1116_v17 }
 0x2b0   : > { %1972 = vmatprep.mubr.msk.f32.mxu0 %vm1479_vm4, %v1451_v20 }
 0x376   : > { %v1946_v37 = vpop.f32.mrb[0].mxu0 }
 0x377   : > { %v1436_v31 = vadd.f32 %v1946_v37, %v1403_v36  ;;  %v1348_v61 = vpop.f32.mrb[1].mxu0 }
 0x378   : > { %v1435_v32 = vadd.f32 %v1398_v38, %v1348_v61 }
 0x379   : > { %v1444_v12 = vmax.f32 %v1436_v31, 0.0 }
 0x37a   : > { %v1443_v40 = vmax.f32 %v1435_v32, 0.0  ;;  %v1949_v55 = vpop.f32.mrb[2].mxu0 }
 0x37b   : > { %v1438_v59 = vadd.f32 %v1949_v55, %v1413_v28  ;;  %v1358_v1 = vpop.f32.mrb[3].mxu0 }
 0x37c   : > { %v2022_v43 = vpack.c.bf16 %v1444_v12, %v1443_v40  ;;  %v1437_v44 = vadd.f32 %v1408_v13, %v1358_v1 }
 0x37d   : > { %v1446_v45 = vmax.f32 %v1438_v59, 0.0 }
 0x37e   : > { %v1445_v46 = vmax.f32 %v1437_v44, 0.0  ;;  %v1952_v47 = vpop.f32.mrb[4].mxu0  ;;  %2023 = vmatprep.subr.bf16.mxu0 %v2022_v43 }
 0x37f   : > { %v1440_v48 = vadd.f32 %v1952_v47, %v1423_v15  ;;  %v1368_v22 = vpop.f32.mrb[5].mxu0  ;;  %2025 = vmatpush3.bf16.msra.mxu0 %v2022_v43 }
 0x380   : > { %v2026_v49 = vpack.c.bf16 %v1446_v45, %v1445_v46  ;;  %v1439_v51 = vadd.f32 %v1418_v30, %v1368_v22 }
 0x381   : > { %v1448_v52 = vmax.f32 %v1440_v48, 0.0 }
 0x382   : > { %v1447_v56 = vmax.f32 %v1439_v51, 0.0  ;;  %v1955_v23 = vpop.f32.mrb[6].mxu0  ;;  %2027 = vmatprep.subr.bf16.mxu0 %v2026_v49 }
 0x383   : > { %v1442_v25 = vadd.f32 %v1955_v23, %v1433_v54  ;;  %v1378_v26 = vpop.f32.mrb[7].mxu0  ;;  %2029 = vmatpush3.bf16.msra.mxu0 %v2026_v49 }
 0x384   : > { %v2030_v57 = vpack.c.bf16 %v1448_v52, %v1447_v56  ;;  %v1441_v11 = vadd.f32 %v1428_v42, %v1378_v26 }
 0x385   : > { %v1450_v9 = vmax.f32 %v1442_v25, 0.0 }
 0x386   : > { %v1449_v58 = vmax.f32 %v1441_v11, 0.0  ;;  %2031 = vmatprep.subr.bf16.mxu0 %v2030_v57 }
 0x387   : > { %2033 = vmatpush3.bf16.msra.mxu0 %v2030_v57 }
 0x388   : > { %v2034_v60 = vpack.c.bf16 %v1450_v9, %v1449_v58 }
 0x38a   : > { %2035 = vmatprep.subr.bf16.mxu0 %v2034_v60 }
 0x38b   : > { %2037 = vmatpush3.bf16.msra.mxu0 %v2034_v60 }
 0x38e   : > { %1973 = vmatmul.mubr.msk.f32.vlgmr.msra.gmra.mrb[8].mxu0 %vm1479_vm4, %v1452_v62 }
 0x38f   : > { %1975 = vmatprep.mubr.msk.f32.mxu0 %vm1479_vm4, %v1453_v19 }
 0x392   : > { %1976 = vmatmul.mubr.msk.f32.gmra.mrb[10].mxu0 %vm1479_vm4, %v1454_v21 }
 0x461   : > { %v1974_v27 = vpop.f32.mrb[8].mxu0 }
 0x462   : > { %v1564_v41 = vadd.f32 %v1974_v27, %v1467_v18  ;;  %v1558_v39 = vpop.f32.mrb[9].mxu0 }
 0x463   : > { %v1559_v53 = vadd.f32 %v1558_v39, %v1462_v29 }
 0x464   : > { %v1578_v50 = vmax.f32 %v1564_v41, 0.0 }
 0x465   : > { %v1577_v63 = vmax.f32 %v1559_v53, 0.0  ;;  %v1977_v14 = vpop.f32.mrb[10].mxu0 }
 0x466   : > { %1582 = vst [vmem:[%s439_s27 + $0x8] sm:$0xff] %v1578_v50  ;;  %v1574_v2 = vadd.f32 %v1977_v14, %v1477_v0  ;;  %v1568_v3 = vpop.f32.mrb[11].mxu0 }
 0x467   : > { %1581 = vst [vmem:[%s439_s27] sm:$0xff] %v1577_v63  ;;  %v1569_v4 = vadd.f32 %v1568_v3, %v1472_v24 }
 0x468   : > { %v1580_v5 = vmax.f32 %v1574_v2, 0.0 }
 0x469   : > { %v1579_v33 = vmax.f32 %v1569_v4, 0.0 }
 0x46a   : > { %1584 = vst [vmem:[%s439_s27 + $0x18] sm:$0xff] %v1580_v5 }
 0x46b   : > { %1583 = vst [vmem:[%s439_s27 + $0x10] sm:$0xff] %v1579_v33 }
 0x46c   : > { %2144 = shalt.err (!%p2141_p11)
}
 0x46d   : > { %s2145_s24 = scalar_lea.hbm %s3128_s21, 512  ;;  %s2149_s18 = scalar_lea.hbm %s3191_s9, 4096 }
 0x46e   : > { %p2146_p12 = scmp.ne.s32.totalorder %s3128_s21, %s2145_s24  ;;  %p2150_p1 = scmp.lt.u32.totalorder %s3128_s21, %s3191_s9 }
 0x46f   : > { %p2151_p2 = scmp.lt.u32.totalorder %s2149_s18, %s2145_s24  ;;  %p2153_p4 = scmp.lt.u32.totalorder %s2145_s24, %s3128_s21 }
 0x470   : > { %p2147_p13 = pnand %p2146_p12, %p2342_p8 }
 0x471   : > { %p2152_p3 = por %p2151_p2, %p2150_p1 }
 0x472   : > { %p2148_p0 = pneg %p2147_p13 }
 0x473   : > { %p2154_p5 = por %p2153_p4, %p2152_p3 }
 0x475   : > { %p2155_p6 = pnand %p2154_p5, %p2148_p0 }
 0x477   : > { %2158 = shalt.err (!%p2155_p6)
}
 0x478   : > { %s2229_s26 = smov 128   ;;  %s2230_s2 = smov 512  }
 0x479   : > { %s2231_s20 = smov 8  }
 0x47a   : > { %2046 = dma.vmem_to_hbm [thread:$0]  (%p2342_p8), %s3123_s17, 512, %s3128_s21, %s1586_s25, %s2229_s26, %s2230_s2, %s2231_s20  }
 0x47b PF: > { %p2052_p7 = scmp.ge.s32.totalorder %s2225_s16, 2  ;;  %s1615_s19 = sand.u32 1, %s2197_s30  }
 0x47c   : > { %s1616_s24 = scalar_lea.sflag [#allocation4], %s1615_s19 }
 0x47d   : > { %p2049_p10 = pnand %p2052_p7, %p2346_p9 }
 0x47f   : > { %2192 = dma.done.wait (!%p2049_p10), %s1616_s24, 512  }
 0x480   : > { %2194 = vsyncadd (!%p2049_p10), %s1616_s24, 4294966784  ;;  %s22_s16 = sadd.s32 1, %s2225_s16   ;;  %s3204_s23 = sld [smem:[#allocation6_spill]] }
 0x481   : > { %p19_p11 = scmp.ge.s32.totalorder %s22_s16, 10   ;;  %s3205_s29 = sld [smem:[#allocation7_spill]] }
 0x482   : > { %s3206_s30 = smov %s2201_s10  ;;  %s3207_s10 = smov %s2205_s11 }
 0x483   : > { %s3208_s11 = smov %s2354_s28  ;;  %s3209_s12 = smov %s2217_s14 }
 0x484   : > { %s3210_s13 = smov %s2221_s15  ;;  %21 = sbr.rel (!%p19_p11) target bundleno = 7 (0x7), region = 143 }
 0x486   : > { %s3211_s14 = smov %s3204_s23 }
 0x487   : > { %s3212_s15 = smov %s3205_s29 }
 0x48b   :  { %1621 = vsyncpa [#allocation4], 1 }
 0x48c   :  { %1623 = vsyncpa [#allocation4 + $0x1], 1 }

</bundles_post_ra>
